<compile_context>
chip_gen: v7x
topology: tpu7x:2x2x1
jax: 0.10.0
libtpu: 0.0.40
codegen_flags: <defaults>
</compile_context>

<pallas_src>
import jax
import jax.numpy as jnp
from jax.experimental import pallas as pl
from jax.experimental.pallas import tpu as pltpu


def _round_up(x: int, m: int) -> int:
    return ((x + m - 1) // m) * m


def _mlp_kernel(state_ref, grad_ref, w1s_ref, w1g_ref, b1_ref, w2_ref, b2_ref,
                out_ref):
    """Fused (split-concat) Linear -> ReLU -> Linear on one batch tile."""
    # Hidden layer: state @ W1_s + grad @ W1_g + b1, ReLU.  Two MXU dots that
    # accumulate in f32 replace the concat + single dot of the reference.
    h = jnp.dot(state_ref[...], w1s_ref[...], preferred_element_type=jnp.float32)
    h = h + jnp.dot(grad_ref[...], w1g_ref[...],
                    preferred_element_type=jnp.float32)
    h = jnp.maximum(h + b1_ref[...], 0.0)          # b1 is (1, H), broadcasts

    # Output layer: h (f32) @ W2 + b2.  Keep h in f32; MXU handles mixed
    # precision if W2 is ever bf16.
    y = jnp.dot(h, w2_ref[...], preferred_element_type=jnp.float32)
    out_ref[...] = (y + b2_ref[...]).astype(out_ref.dtype)


def metadynamic_kernel_forward(state, grad, w1, b1, w2, b2, *,
                               batch_tile: int = 256):
    """Wrapper: 1-D promotion, W1 split, batch tiling, and the pallas_call.

    Args:
      state: (B, state_dim) or (state_dim,)
      grad:  (B, grad_dim)  or (grad_dim,)
      w1:    (state_dim + grad_dim, hidden_dim)   # == torch linear1 weight.T
      b1:    (hidden_dim,)
      w2:    (hidden_dim, state_dim)              # == torch linear2 weight.T
      b2:    (state_dim,)
    Returns:
      (B, state_dim) state update delta_z (B==1 if inputs were 1-D).
    """
    if state.ndim == 1:
        state = state[None, :]
    if grad.ndim == 1:
        grad = grad[None, :]

    batch = state.shape[0]
    state_dim = state.shape[1]
    grad_dim = grad.shape[1]
    hidden_dim = w1.shape[1]

    # Split W1 once at trace time -> no in-kernel lane-axis concat.
    w1_s = w1[:state_dim]          # (state_dim, hidden_dim)
    w1_g = w1[state_dim:]          # (grad_dim,  hidden_dim)

    # Keep biases 2-D (1, N) so they live cleanly in VMEM vregs.
    b1_2d = b1.reshape(1, hidden_dim)
    b2_2d = b2.reshape(1, state_dim)

    # Batch tiling: tile must be a multiple of 8 (sublane rule); pad the batch
    # up to a whole number of tiles and slice the result back afterwards.
    tb = min(batch_tile, _round_up(batch, 8))
    tb = _round_up(tb, 8)
    b_pad = _round_up(batch, tb)
    if b_pad != batch:
        state = jnp.pad(state, ((0, b_pad - batch), (0, 0)))
        grad = jnp.pad(grad, ((0, b_pad - batch), (0, 0)))

    out_shape = jax.ShapeDtypeStruct((b_pad, state_dim), state.dtype)

    fn = pl.pallas_call(
        _mlp_kernel,
        out_shape=out_shape,
        grid=(b_pad // tb,),
        in_specs=[
            pl.BlockSpec((tb, state_dim), lambda i: (i, 0)),          # state
            pl.BlockSpec((tb, grad_dim), lambda i: (i, 0)),           # grad
            pl.BlockSpec((state_dim, hidden_dim), lambda i: (0, 0)),  # W1_s
            pl.BlockSpec((grad_dim, hidden_dim), lambda i: (0, 0)),   # W1_g
            pl.BlockSpec((1, hidden_dim), lambda i: (0, 0)),          # b1
            pl.BlockSpec((hidden_dim, state_dim), lambda i: (0, 0)),  # W2
            pl.BlockSpec((1, state_dim), lambda i: (0, 0)),           # b2
        ],
        out_specs=pl.BlockSpec((tb, state_dim), lambda i: (i, 0)),
        compiler_params=pltpu.CompilerParams(
            dimension_semantics=("parallel",)),   # v7x: shard tiles over 2 TCs
    )
    out = fn(state, grad, w1_s, w1_g, b1_2d, w2, b2_2d)
    if b_pad != batch:
        out = out[:batch]
    return out


def init_params(key, state_dim, grad_dim, hidden_dim, dtype=jnp.float32):
    """Init mirroring nn.Linear defaults (U(-1/sqrt(fan_in), 1/sqrt(fan_in)))."""
    k1, k2, k3, k4 = jax.random.split(key, 4)
    in1 = state_dim + grad_dim
    bound1 = 1.0 / jnp.sqrt(in1)
    bound2 = 1.0 / jnp.sqrt(hidden_dim)
    # Stored as (in_features, out_features) == torch_weight.T
    w1 = jax.random.uniform(k1, (in1, hidden_dim), dtype, -bound1, bound1)
    b1 = jax.random.uniform(k2, (hidden_dim,), dtype, -bound1, bound1)
    w2 = jax.random.uniform(k3, (hidden_dim, state_dim), dtype, -bound2, bound2)
    b2 = jax.random.uniform(k4, (state_dim,), dtype, -bound2, bound2)
    return w1, b1, w2, b2


def reference_forward(state, grad, w1, b1, w2, b2):
    """Plain-JAX reference for validation (matches the PyTorch module)."""
    if state.ndim == 1:
        state = state[None, :]
    if grad.ndim == 1:
        grad = grad[None, :]
    x = jnp.concatenate([state, grad], axis=1)
    h = jnp.maximum(x @ w1 + b1, 0.0)
    return h @ w2 + b2


if __name__ == "__main__":
    # Small, deterministic shapes consistent with the module.
    batch = 8
    state_dim = 32
    grad_dim = 32
    hidden_dim = 128

    key = jax.random.PRNGKey(0)
    kp, ks, kg, ks2, kg2 = jax.random.split(key, 5)

    w1, b1, w2, b2 = init_params(kp, state_dim, grad_dim, hidden_dim)
    state = jax.random.normal(ks, (batch, state_dim), jnp.float32)
    grad = jax.random.normal(kg, (batch, grad_dim), jnp.float32)

    out = metadynamic_kernel_forward(state, grad, w1, b1, w2, b2)
    out = jax.block_until_ready(out)
    ref = reference_forward(state, grad, w1, b1, w2, b2)
    assert out.shape == (batch, state_dim)
    assert jnp.allclose(out, ref, atol=1e-5, rtol=1e-5), "mismatch vs reference"

    # 1-D input path (PyTorch's unsqueeze(0) semantics).
    out1d = metadynamic_kernel_forward(state[0], grad[0], w1, b1, w2, b2)
    out1d = jax.block_until_ready(out1d)
    assert out1d.shape == (1, state_dim)
    assert jnp.allclose(out1d, ref[0:1], atol=1e-5, rtol=1e-5)

    # Multi-tile / padded batch path (exercises the grid + VMEM-resident
    # weights and the padding slice-back).
    big_b = 300
    state_b = jax.random.normal(ks2, (big_b, state_dim), jnp.float32)
    grad_b = jax.random.normal(kg2, (big_b, grad_dim), jnp.float32)
    out_b = metadynamic_kernel_forward(state_b, grad_b, w1, b1, w2, b2)
    out_b = jax.block_until_ready(out_b)
    ref_b = reference_forward(state_b, grad_b, w1, b1, w2, b2)
    assert out_b.shape == (big_b, state_dim)
    assert jnp.allclose(out_b, ref_b, atol=1e-5, rtol=1e-5), "big-batch mismatch"

    print("KERNEL_OK")
</pallas_src>

<mosaic_0001>
module attributes {stable_mosaic.version = 11 : i64} {
  func.func @_mlp_kernel(%arg0: i32, %arg1: memref<8x32xf32, #tpu.memory_space<vmem>>, %arg2: memref<8x32xf32, #tpu.memory_space<vmem>>, %arg3: memref<32x128xf32, #tpu.memory_space<vmem>>, %arg4: memref<32x128xf32, #tpu.memory_space<vmem>>, %arg5: memref<1x128xf32, #tpu.memory_space<vmem>>, %arg6: memref<128x32xf32, #tpu.memory_space<vmem>>, %arg7: memref<1x32xf32, #tpu.memory_space<vmem>>, %arg8: memref<8x32xf32, #tpu.memory_space<vmem>>) attributes {dimension_semantics = [#tpu.dimension_semantics<parallel>], iteration_bounds = array<i64: 1>, scalar_prefetch = 0 : i64, scratch_operands = 0 : i64, tpu.core_type = #tpu.core_type<tc>, window_params = [{transform_indices = @transform_0, window_bounds = array<i64: 8, 32>}, {transform_indices = @transform_1, window_bounds = array<i64: 8, 32>}, {pipeline_mode = #tpu.pipeline_mode<synchronous>, transform_indices = @transform_2, window_bounds = array<i64: 32, 128>}, {pipeline_mode = #tpu.pipeline_mode<synchronous>, transform_indices = @transform_3, window_bounds = array<i64: 32, 128>}, {pipeline_mode = #tpu.pipeline_mode<synchronous>, transform_indices = @transform_4, window_bounds = array<i64: 1, 128>}, {pipeline_mode = #tpu.pipeline_mode<synchronous>, transform_indices = @transform_5, window_bounds = array<i64: 128, 32>}, {pipeline_mode = #tpu.pipeline_mode<synchronous>, transform_indices = @transform_6, window_bounds = array<i64: 1, 32>}, {transform_indices = @transform_7, window_bounds = array<i64: 8, 32>}]} {
    %c0 = arith.constant 0 : index
    %c0_0 = arith.constant 0 : index
    %0 = vector.load %arg1[%c0, %c0_0] : memref<8x32xf32, #tpu.memory_space<vmem>>, vector<8x32xf32>
    %c0_1 = arith.constant 0 : index
    %c0_2 = arith.constant 0 : index
    %1 = vector.load %arg3[%c0_1, %c0_2] : memref<32x128xf32, #tpu.memory_space<vmem>>, vector<32x128xf32>
    %cst = arith.constant dense<0.000000e+00> : vector<8x128xf32>
    %2 = tpu.matmul %0, %1, %cst {dimension_numbers = #tpu.dot_dimension_numbers<[1], [0], [0], [1], [0, 0, 1, 1], [], []>} : vector<8x32xf32>, vector<32x128xf32>, vector<8x128xf32> -> vector<8x128xf32>
    %c0_3 = arith.constant 0 : index
    %c0_4 = arith.constant 0 : index
    %3 = vector.load %arg2[%c0_3, %c0_4] : memref<8x32xf32, #tpu.memory_space<vmem>>, vector<8x32xf32>
    %c0_5 = arith.constant 0 : index
    %c0_6 = arith.constant 0 : index
    %4 = vector.load %arg4[%c0_5, %c0_6] : memref<32x128xf32, #tpu.memory_space<vmem>>, vector<32x128xf32>
    %cst_7 = arith.constant dense<0.000000e+00> : vector<8x128xf32>
    %5 = tpu.matmul %3, %4, %cst_7 {dimension_numbers = #tpu.dot_dimension_numbers<[1], [0], [0], [1], [0, 0, 1, 1], [], []>} : vector<8x32xf32>, vector<32x128xf32>, vector<8x128xf32> -> vector<8x128xf32>
    %6 = arith.addf %2, %5 : vector<8x128xf32>
    %c0_8 = arith.constant 0 : index
    %c0_9 = arith.constant 0 : index
    %7 = vector.load %arg5[%c0_8, %c0_9] : memref<1x128xf32, #tpu.memory_space<vmem>>, vector<1x128xf32>
    %8 = vector.broadcast %7 : vector<1x128xf32> to vector<8x128xf32>
    %9 = arith.addf %6, %8 : vector<8x128xf32>
    %cst_10 = arith.constant 0.000000e+00 : f32
    %10 = vector.broadcast %cst_10 : f32 to vector<8x128xf32>
    %11 = arith.maximumf %9, %10 : vector<8x128xf32>
    %c0_11 = arith.constant 0 : index
    %c0_12 = arith.constant 0 : index
    %12 = vector.load %arg6[%c0_11, %c0_12] : memref<128x32xf32, #tpu.memory_space<vmem>>, vector<128x32xf32>
    %cst_13 = arith.constant dense<0.000000e+00> : vector<8x32xf32>
    %13 = tpu.matmul %11, %12, %cst_13 {dimension_numbers = #tpu.dot_dimension_numbers<[1], [0], [0], [1], [0, 0, 1, 1], [], []>} : vector<8x128xf32>, vector<128x32xf32>, vector<8x32xf32> -> vector<8x32xf32>
    %c0_14 = arith.constant 0 : index
    %c0_15 = arith.constant 0 : index
    %14 = vector.load %arg7[%c0_14, %c0_15] : memref<1x32xf32, #tpu.memory_space<vmem>>, vector<1x32xf32>
    %15 = vector.broadcast %14 : vector<1x32xf32> to vector<8x32xf32>
    %16 = arith.addf %13, %15 : vector<8x32xf32>
    %c0_16 = arith.constant 0 : index
    %c0_17 = arith.constant 0 : index
    %17 = vector.load %arg8[%c0_16, %c0_17] : memref<8x32xf32, #tpu.memory_space<vmem>>, vector<8x32xf32>
    tpu.vector_store %arg8[%c0_16, %c0_17], %16 {strides = array<i32>} : memref<8x32xf32, #tpu.memory_space<vmem>>, vector<8x32xf32>,
    return
  }
  func.func @transform_0(%arg0: i32) -> (i32, i32) {
    %c0_i32 = arith.constant 0 : i32
    %c0_i32_0 = arith.constant 0 : i32
    return %arg0, %c0_i32 : i32, i32
  }
  func.func @transform_1(%arg0: i32) -> (i32, i32) {
    %c0_i32 = arith.constant 0 : i32
    %c0_i32_0 = arith.constant 0 : i32
    return %arg0, %c0_i32 : i32, i32
  }
  func.func @transform_2(%arg0: i32) -> (i32, i32) {
    %c0_i32 = arith.constant 0 : i32
    %c0_i32_0 = arith.constant 0 : i32
    %c0_i32_1 = arith.constant 0 : i32
    return %c0_i32, %c0_i32_0 : i32, i32
  }
  func.func @transform_3(%arg0: i32) -> (i32, i32) {
    %c0_i32 = arith.constant 0 : i32
    %c0_i32_0 = arith.constant 0 : i32
    %c0_i32_1 = arith.constant 0 : i32
    return %c0_i32, %c0_i32_0 : i32, i32
  }
  func.func @transform_4(%arg0: i32) -> (i32, i32) {
    %c0_i32 = arith.constant 0 : i32
    %c0_i32_0 = arith.constant 0 : i32
    %c0_i32_1 = arith.constant 0 : i32
    return %c0_i32, %c0_i32_0 : i32, i32
  }
  func.func @transform_5(%arg0: i32) -> (i32, i32) {
    %c0_i32 = arith.constant 0 : i32
    %c0_i32_0 = arith.constant 0 : i32
    %c0_i32_1 = arith.constant 0 : i32
    return %c0_i32, %c0_i32_0 : i32, i32
  }
  func.func @transform_6(%arg0: i32) -> (i32, i32) {
    %c0_i32 = arith.constant 0 : i32
    %c0_i32_0 = arith.constant 0 : i32
    %c0_i32_1 = arith.constant 0 : i32
    return %c0_i32, %c0_i32_0 : i32, i32
  }
  func.func @transform_7(%arg0: i32) -> (i32, i32) {
    %c0_i32 = arith.constant 0 : i32
    %c0_i32_0 = arith.constant 0 : i32
    return %arg0, %c0_i32 : i32, i32
  }
}

</mosaic_0001>

<bundles_post_ra>
// kernel: tpu_custom_call.1
= control target key start
LH: loop header
LB: loop body
LE: loop exit
PB: predicated region body
PF: predicated region fallthrough
CT: control target
= control target key end

     0   :  { %v453_v3 = vmov 0.0|0.0   ;;  %vm454_vm0 = vmmov 0   ;;  %v455_v6 = vmov 0.0   ;;  %s611_s0 = inlined_call_operand.vmem [shape: f32[8,32], index: 0, kind: input, shape index: {}]   ;;  %s612_s1 = inlined_call_operand.vmem [shape: f32[8,32], index: 1, kind: input, shape index: {}]   ;;  %s613_s2 = inlined_call_operand.vmem [shape: f32[32,128], index: 2, kind: input, shape index: {}]   ;;  %s614_s3 = inlined_call_operand.vmem [shape: f32[32,128], index: 3, kind: input, shape index: {}]   ;;  %s615_s4 = inlined_call_operand.vmem [shape: f32[1,128], index: 4, kind: input, shape index: {}]   ;;  %s616_s5 = inlined_call_operand.vmem [shape: f32[128,32], index: 5, kind: input, shape index: {}]   ;;  %s617_s6 = inlined_call_operand.vmem [shape: f32[1,32], index: 6, kind: input, shape index: {}]   ;;  %s618_s7 = inlined_call_operand.hbm [shape: f32[8,32], index: 7, kind: output, shape index: {}]  }
   0x1   :  { %v33_v0 = vld [vmem:[%s614_s3] sm:$0xff]  ;;  %v34_v1 = vld [vmem:[%s614_s3 + $0x8] sm:$0xff]  ;;  %v35_v2 = vld [vmem:[%s614_s3 + $0x10] sm:$0xff]  ;;  %389 = vmatprep.subr.bf16.mxu1 %v453_v3  ;;  %340 = vmatprep.mubr.msk.f32.mxu1 %vm454_vm0, %v455_v6 }
   0x2   :  { %v390_v4 = vpack.c.bf16 %v34_v1, %v33_v0  ;;  %v36_v5 = vld [vmem:[%s614_s3 + $0x18] sm:$0xff]  ;;  %401 = vmatprep.subr.bf16.mxu0 %v453_v3  ;;  %386 = vmatprep.mubr.msk.f32.mxu0 %vm454_vm0, %v455_v6  ;;  %v28_v8 = vld [vmem:[%s613_s2] sm:$0xff]  ;;  %v194_v10 = vld [vmem:[%s616_s5 + $0x8] sm:$0xff] }
   0x3   :  { %v393_v7 = vpack.c.bf16 %v36_v5, %v35_v2  ;;  %v193_v9 = vld [vmem:[%s616_s5] sm:$0xff]  ;;  %v29_v11 = vld [vmem:[%s613_s2 + $0x8] sm:$0xff]  ;;  %v195_v13 = vld [vmem:[%s616_s5 + $0x10] sm:$0xff] }
   0x4   :  { %391 = vmatpush3.bf16.msra.mxu1 %v390_v4  ;;  %v402_v12 = vpack.c.bf16 %v194_v10, %v193_v9  ;;  %v196_v14 = vld [vmem:[%s616_s5 + $0x18] sm:$0xff] }
   0x5   :  { %392 = vmatprep.subr.bf16.mxu1 %v453_v3  ;;  %v405_v15 = vpack.c.bf16 %v196_v14, %v195_v13 }
   0x6   :  { %403 = vmatpush3.bf16.msra.mxu0 %v402_v12 }
   0x7   :  { %12 = vsyncpa [#allocation3], 0  ;;  %v32_v16 = vld [vmem:[%s612_s1] sm:$0xff]  ;;  %vm37_vm1 = vcmask 261120   ;;  %v396_v17 = vpack.c.bf16 %v29_v11, %v28_v8  ;;  %404 = vmatprep.subr.bf16.mxu0 %v453_v3  ;;  %v198_v19 = vld [vmem:[%s616_s5 + $0x28] sm:$0xff]  ;;  %s456_s1 = smov [#allocation2]  }
   0x8   :  { %394 = vmatpush3.bf16.msra.mxu1 %v393_v7  ;;  %v197_v18 = vld [vmem:[%s616_s5 + $0x20] sm:$0xff]  ;;  %v30_v20 = vld [vmem:[%s613_s2 + $0x10] sm:$0xff]  ;;  %v31_v21 = vld [vmem:[%s613_s2 + $0x18] sm:$0xff] }
   0x9   :  { %395 = vmatprep.subr.bf16.mxu1 %v453_v3  ;;  %v408_v22 = vpack.c.bf16 %v198_v19, %v197_v18  ;;  %v399_v23 = vpack.c.bf16 %v31_v21, %v30_v20  ;;  %v199_v24 = vld [vmem:[%s616_s5 + $0x30] sm:$0xff]  ;;  %v200_v25 = vld [vmem:[%s616_s5 + $0x38] sm:$0xff]  ;;  %v27_v27 = vld [vmem:[%s611_s0] sm:$0xff] }
   0xa   :  { %406 = vmatpush3.bf16.msra.mxu0 %v405_v15  ;;  %v411_v26 = vpack.c.bf16 %v200_v25, %v199_v24  ;;  %v201_v28 = vld [vmem:[%s616_s5 + $0x40] sm:$0xff]  ;;  %v202_v29 = vld [vmem:[%s616_s5 + $0x48] sm:$0xff]  ;;  %v203_v31 = vld [vmem:[%s616_s5 + $0x50] sm:$0xff] }
   0xb   :  { %341 = vmatmul.mubr.msk.f32.vlgmr.msra.gmra.mrb[0].mxu1 %vm37_vm1, %v32_v16  ;;  %407 = vmatprep.subr.bf16.mxu0 %v453_v3  ;;  %v414_v30 = vpack.c.bf16 %v202_v29, %v201_v28  ;;  %v204_v32 = vld [vmem:[%s616_s5 + $0x58] sm:$0xff]  ;;  %v205_v34 = vld [vmem:[%s616_s5 + $0x60] sm:$0xff]  ;;  %v206_v35 = vld [vmem:[%s616_s5 + $0x68] sm:$0xff] }
   0xc   :  { %397 = vmatpush3.bf16.msra.mxu1 %v396_v17  ;;  %351 = vmatprep.mubr.msk.f32.mxu1 %vm454_vm0, %v455_v6  ;;  %v417_v33 = vpack.c.bf16 %v204_v32, %v203_v31  ;;  %v420_v36 = vpack.c.bf16 %v206_v35, %v205_v34  ;;  %v207_v37 = vld [vmem:[%s616_s5 + $0x70] sm:$0xff]  ;;  %v208_v38 = vld [vmem:[%s616_s5 + $0x78] sm:$0xff]  ;;  %v303_v43 = vld [vmem:[%s615_s4] ss:$0 sm:$0xff]  ;;  %s293_s5 = sshll.u32 %s456_s1, 4  ;;  %s294_s5 = int_to_ptr.vmem [resolvable:$true] %s293_s5 }
   0xd   :  { %398 = vmatprep.subr.bf16.mxu1 %v453_v3  ;;  %v423_v39 = vpack.c.bf16 %v208_v38, %v207_v37  ;;  %v304_v48 = vld [vmem:[%s617_s6] ss:$0 sm:$0xff]  ;;  %s429_s29 = scalar_lea.vmem %s294_s5, 128  ;;  %p434_p1 = scmp.lt.s32.totalorder %s294_s5, %s294_s5 }
   0xe   :  { %409 = vmatpush3.bf16.msra.mxu0 %v408_v22  ;;  %p430_p0 = scmp.ne.s32.totalorder %s294_s5, %s429_s29  ;;  %p435_p2 = scmp.lt.s32.totalorder %s429_s29, %s429_s29 }
   0xf   :  { %410 = vmatprep.subr.bf16.mxu0 %v453_v3 }
  0x10   :  { %400 = vmatpush3.bf16.msra.mxu1 %v399_v23  ;;  %p436_p3 = por %p435_p2, %p434_p1 }
  0x12   :  { %412 = vmatpush3.bf16.msra.mxu0 %v411_v26  ;;  %p437_p4 = pnand %p436_p3, %p430_p0 }
  0x13   :  { %352 = vmatmul.mubr.msk.f32.vlgmr.msra.gmra.mrb[2].mxu1 %vm37_vm1, %v27_v27  ;;  %413 = vmatprep.subr.bf16.mxu0 %v453_v3 }
  0x16   :  { %415 = vmatpush3.bf16.msra.mxu0 %v414_v30 }
  0x17   :  { %416 = vmatprep.subr.bf16.mxu0 %v453_v3 }
  0x1a   :  { %418 = vmatpush3.bf16.msra.mxu0 %v417_v33 }
  0x1b   :  { %419 = vmatprep.subr.bf16.mxu0 %v453_v3 }
  0x1e   :  { %421 = vmatpush3.bf16.msra.mxu0 %v420_v36 }
  0x1f   :  { %422 = vmatprep.subr.bf16.mxu0 %v453_v3 }
  0x22   :  { %424 = vmatpush3.bf16.msra.mxu0 %v423_v39 }
  0xde   :  { %v107_v40 = vpop.f32.mrb[0].mxu1 }
  0xdf   :  { %v342_v41 = vpop.f32.mrb[1].mxu1 }
  0xe6   :  { %v180_v42 = vpop.f32.mrb[2].mxu1 }
  0xe7   :  { %v181_v44 = vadd.f32 %v180_v42, %v107_v40  ;;  %v353_v45 = vpop.f32.mrb[3].mxu1 }
  0xe9   :  { %v191_v46 = vadd.f32 %v303_v43, %v181_v44 }
  0xeb   :  { %v192_v47 = vmax.f32 %v191_v46, 0.0 }
  0xed   :  { %387 = vmatmul.mubr.f32.vlgmr.msra.gmra.mrb[0].mxu0 %v192_v47 }
 0x1c0   :  { %v282_v49 = vpop.f32.mrb[0].mxu0 }
 0x1c1   :  { %v283_v50 = vadd.f32 %v304_v48, %v282_v49  ;;  %v388_v51 = vpop.f32.mrb[1].mxu0 }
 0x1c3   :  { %286 = vst.msk [vmem:[#allocation2] sm:$0xff] %vm37_vm1, %v283_v50 }
 0x1c4   :  { %440 = shalt.err (!%p437_p4)
}
 0x1c5   :  { %s441_s8 = scalar_lea.hbm %s618_s7, 128 }
 0x1c6   :  { %p442_p5 = scmp.ne.s32.totalorder %s618_s7, %s441_s8  ;;  %p445_p6 = scmp.lt.u32.totalorder %s441_s8, %s618_s7 }
 0x1c8   :  { %p447_p7 = pnand %p445_p6, %p442_p5 }
 0x1ca   :  { %450 = shalt.err (!%p447_p7)
}
 0x1cb   :  { %296 = dma.vmem_to_hbm [thread:$0]  %s294_s5, 128, %s618_s7, [#allocation3]  }
 0x1cc   :  { %451 = dma.done.wait [#allocation3], 128  }
 0x1cd   :  { %452 = vsyncadd [#allocation3], 4294967168 }
 0x1ce   :  { %300 = vsyncpa [#allocation3], 1 }

</bundles_post_ra>
